<compile_context>
chip_gen: v7x
topology: tpu7x:2x2x1
jax: 0.10.0
libtpu: 0.0.40
codegen_flags: <defaults>
</compile_context>

<pallas_src>
import jax
import jax.numpy as jnp
from jax.experimental import pallas as pl
from jax.experimental.pallas import tpu as pltpu


def _round_up(x, m):
    return (x + m - 1) // m * m


def _cdiv(a, b):
    return (a + b - 1) // b


def _fused_head_kernel(x_ref, w1_ref, b1_ref, w2_ref, b2_ref, out_ref):
    # x: (TB, K) bf16 | w1: (K, E_pad) bf16 | b1: (1, E_pad) f32
    # w2: (E_pad, N_pad) bf16 | b2: (1, N_pad) f32 | out: (TB, N_pad) f32
    h = jnp.dot(x_ref[...], w1_ref[...],
                preferred_element_type=jnp.float32) + b1_ref[...]
    h = jnp.maximum(h, 0.0)                                   # ReLU in f32 on the VPU
    logits = jnp.dot(h.astype(jnp.bfloat16), w2_ref[...],
                     preferred_element_type=jnp.float32) + b2_ref[...]
    out_ref[...] = logits                                     # lane-dense (N_pad=128) unmasked vst


def fused_clip_classifier(flat_images, w1, b1, w2, b2, num_classes, *, block_b=2048):
    """logits = relu(flat_images @ w1 + b1) @ w2 + b2, computed in one pallas_call."""
    B, K = flat_images.shape
    E_pad = w1.shape[1]
    N_pad = w2.shape[1]

    # Adaptive batch tiling:
    #  - split B into near-equal sublane-aligned (x8) tiles so the final tile
    #    carries at most 7 padded rows (no up-to-a-full-tile DMA/MXU waste),
    #  - prefer >= 2 grid steps when B is large enough so the "parallel" batch
    #    axis can shard across both TensorCores on v7x,
    #  - cap the tile at block_b so double-buffered bf16 tiles stay well under
    #    the scoped VMEM limit on every generation (~11 MiB at TB=2048, K=768).
    n_tiles = max(_cdiv(B, block_b), min(2, _cdiv(B, 8)))
    TB = min(_round_up(_cdiv(B, n_tiles), 8), _round_up(block_b, 8))
    B_pad = _round_up(B, TB)

    # bf16 HBM stream for the big activation matrix; cast fused with the pad.
    x = flat_images.astype(jnp.bfloat16)
    if B_pad != B:
        x = jnp.pad(x, ((0, B_pad - B), (0, 0)))

    out = pl.pallas_call(
        _fused_head_kernel,
        out_shape=jax.ShapeDtypeStruct((B_pad, N_pad), jnp.float32),
        grid=(B_pad // TB,),
        in_specs=[
            pl.BlockSpec((TB, K), lambda i: (i, 0)),        # streamed bf16 activations
            pl.BlockSpec((K, E_pad), lambda i: (0, 0)),     # VMEM-resident bf16 weights
            pl.BlockSpec((1, E_pad), lambda i: (0, 0)),
            pl.BlockSpec((E_pad, N_pad), lambda i: (0, 0)),
            pl.BlockSpec((1, N_pad), lambda i: (0, 0)),
        ],
        out_specs=pl.BlockSpec((TB, N_pad), lambda i: (i, 0)),
        compiler_params=pltpu.CompilerParams(
            dimension_semantics=("parallel",)),
    )(x, w1, b1, w2, b2)

    return out[:B, :num_classes]


class ClipClassifierPallas:
    def __init__(self, key, image_shape=(3, 16, 16), clip_output_dim=64,
                 embed_dim=32, num_classes=2, block_b=2048):
        k0, k1, k2, k3, k4 = jax.random.split(key, 5)
        in_flat = image_shape[0] * image_shape[1] * image_shape[2]
        self.num_classes = num_classes
        self.block_b = block_b

        # TODO(synk): the real frozen CLIP visual encoder is an external
        # pretrained model with no synthetic Pallas equivalent; it is replaced
        # by a deterministic frozen linear projection (flatten -> matmul) that
        # matches encode_image()'s contract of (B, clip_output_dim) f32 feats.
        # The algebraic fold below into fc is only valid for this linear stub.
        self.w_enc = jax.random.normal(k0, (in_flat, clip_output_dim), jnp.float32) * 0.02

        # fc = nn.Linear(clip_output_dim, embed_dim)   (PyTorch weight layout)
        lim1 = 1.0 / (clip_output_dim ** 0.5)
        self.w_fc = jax.random.uniform(k1, (embed_dim, clip_output_dim), jnp.float32, -lim1, lim1)
        self.b_fc = jax.random.uniform(k2, (embed_dim,), jnp.float32, -lim1, lim1)
        # classifier = nn.Linear(embed_dim, num_classes)
        lim2 = 1.0 / (embed_dim ** 0.5)
        self.w_cls = jax.random.uniform(k3, (num_classes, embed_dim), jnp.float32, -lim2, lim2)
        self.b_cls = jax.random.uniform(k4, (num_classes,), jnp.float32, -lim2, lim2)

        # ---- One-time weight prep (hoisted out of the forward path) ----
        E_pad = _round_up(embed_dim, 128)                       # full MXU tile width
        N_pad = _round_up(max(num_classes, 128), 128)           # lane-dense output
        w_combined = self.w_enc @ self.w_fc.T                   # (in_flat, embed_dim)

        w1 = jnp.zeros((in_flat, E_pad), jnp.float32).at[:, :embed_dim].set(w_combined)
        self.w1 = w1.astype(jnp.bfloat16)                       # bf16 MXU operand
        self.b1 = jnp.zeros((1, E_pad), jnp.float32).at[:, :embed_dim].set(self.b_fc)
        w2 = (jnp.zeros((E_pad, N_pad), jnp.float32)
              .at[:embed_dim, :num_classes].set(self.w_cls.T))
        self.w2 = w2.astype(jnp.bfloat16)                       # bf16 second matmul
        self.b2 = jnp.zeros((1, N_pad), jnp.float32).at[:, :num_classes].set(self.b_cls)

    def __call__(self, images):
        B = images.shape[0]
        flat = images.reshape(B, -1)                            # NCHW -> (B, C*H*W)
        return fused_clip_classifier(flat, self.w1, self.b1, self.w2, self.b2,
                                      self.num_classes, block_b=self.block_b)


if __name__ == "__main__":
    key = jax.random.PRNGKey(0)
    k_model, k_img = jax.random.split(key)

    B, C, H, W = 2, 3, 16, 16
    model = ClipClassifierPallas(k_model, image_shape=(C, H, W),
                                 clip_output_dim=64, embed_dim=32)
    images = jax.random.normal(k_img, (B, C, H, W), jnp.float32)   # NCHW like PyTorch

    logits = model(images)
    jax.block_until_ready(logits)

    # Plain-JAX reference mirroring the kernel math (fused linear encoder+fc,
    # bf16 MXU inputs with f32 accumulation, f32 elementwise + bias adds).
    flat = images.reshape(B, -1)
    w_comb = model.w_enc @ model.w_fc.T
    h = jnp.dot(flat.astype(jnp.bfloat16), w_comb.astype(jnp.bfloat16),
                preferred_element_type=jnp.float32) + model.b_fc
    h = jnp.maximum(h, 0.0)
    ref = jnp.dot(h.astype(jnp.bfloat16), model.w_cls.T.astype(jnp.bfloat16),
                  preferred_element_type=jnp.float32) + model.b_cls

    assert logits.shape == (B, 2)
    assert jnp.allclose(logits, ref, atol=2e-3, rtol=2e-3), (
        f"max abs err {jnp.max(jnp.abs(logits - ref))}")

    print("KERNEL_OK")
</pallas_src>

<mosaic_0001>
module attributes {stable_mosaic.version = 11 : i64} {
  func.func @_fused_head_kernel(%arg0: i32, %arg1: memref<8x768xbf16, #tpu.memory_space<vmem>>, %arg2: memref<768x128xbf16, #tpu.memory_space<vmem>>, %arg3: memref<1x128xf32, #tpu.memory_space<vmem>>, %arg4: memref<128x128xbf16, #tpu.memory_space<vmem>>, %arg5: memref<1x128xf32, #tpu.memory_space<vmem>>, %arg6: memref<8x128xf32, #tpu.memory_space<vmem>>) attributes {dimension_semantics = [#tpu.dimension_semantics<parallel>], iteration_bounds = array<i64: 1>, scalar_prefetch = 0 : i64, scratch_operands = 0 : i64, tpu.core_type = #tpu.core_type<tc>, window_params = [{transform_indices = @transform_0, window_bounds = array<i64: 8, 768>}, {pipeline_mode = #tpu.pipeline_mode<synchronous>, transform_indices = @transform_1, window_bounds = array<i64: 768, 128>}, {pipeline_mode = #tpu.pipeline_mode<synchronous>, transform_indices = @transform_2, window_bounds = array<i64: 1, 128>}, {pipeline_mode = #tpu.pipeline_mode<synchronous>, transform_indices = @transform_3, window_bounds = array<i64: 128, 128>}, {pipeline_mode = #tpu.pipeline_mode<synchronous>, transform_indices = @transform_4, window_bounds = array<i64: 1, 128>}, {transform_indices = @transform_5, window_bounds = array<i64: 8, 128>}]} {
    %c0 = arith.constant 0 : index
    %c0_0 = arith.constant 0 : index
    %0 = vector.load %arg1[%c0, %c0_0] : memref<8x768xbf16, #tpu.memory_space<vmem>>, vector<8x768xbf16>
    %c0_1 = arith.constant 0 : index
    %c0_2 = arith.constant 0 : index
    %1 = vector.load %arg2[%c0_1, %c0_2] : memref<768x128xbf16, #tpu.memory_space<vmem>>, vector<768x128xbf16>
    %cst = arith.constant dense<0.000000e+00> : vector<8x128xf32>
    %2 = tpu.matmul %0, %1, %cst {dimension_numbers = #tpu.dot_dimension_numbers<[1], [0], [0], [1], [0, 0, 1, 1], [], []>} : vector<8x768xbf16>, vector<768x128xbf16>, vector<8x128xf32> -> vector<8x128xf32>
    %c0_3 = arith.constant 0 : index
    %c0_4 = arith.constant 0 : index
    %3 = vector.load %arg3[%c0_3, %c0_4] : memref<1x128xf32, #tpu.memory_space<vmem>>, vector<1x128xf32>
    %4 = vector.broadcast %3 : vector<1x128xf32> to vector<8x128xf32>
    %5 = arith.addf %2, %4 : vector<8x128xf32>
    %cst_5 = arith.constant 0.000000e+00 : f32
    %6 = vector.broadcast %cst_5 : f32 to vector<8x128xf32>
    %7 = arith.maximumf %5, %6 : vector<8x128xf32>
    %8 = arith.truncf %7 : vector<8x128xf32> to vector<8x128xbf16>
    %c0_6 = arith.constant 0 : index
    %c0_7 = arith.constant 0 : index
    %9 = vector.load %arg4[%c0_6, %c0_7] : memref<128x128xbf16, #tpu.memory_space<vmem>>, vector<128x128xbf16>
    %cst_8 = arith.constant dense<0.000000e+00> : vector<8x128xf32>
    %10 = tpu.matmul %8, %9, %cst_8 {dimension_numbers = #tpu.dot_dimension_numbers<[1], [0], [0], [1], [0, 0, 1, 1], [], []>} : vector<8x128xbf16>, vector<128x128xbf16>, vector<8x128xf32> -> vector<8x128xf32>
    %c0_9 = arith.constant 0 : index
    %c0_10 = arith.constant 0 : index
    %11 = vector.load %arg5[%c0_9, %c0_10] : memref<1x128xf32, #tpu.memory_space<vmem>>, vector<1x128xf32>
    %12 = vector.broadcast %11 : vector<1x128xf32> to vector<8x128xf32>
    %13 = arith.addf %10, %12 : vector<8x128xf32>
    %c0_11 = arith.constant 0 : index
    %c0_12 = arith.constant 0 : index
    %14 = vector.load %arg6[%c0_11, %c0_12] : memref<8x128xf32, #tpu.memory_space<vmem>>, vector<8x128xf32>
    tpu.vector_store %arg6[%c0_11, %c0_12], %13 {strides = array<i32>} : memref<8x128xf32, #tpu.memory_space<vmem>>, vector<8x128xf32>,
    return
  }
  func.func @transform_0(%arg0: i32) -> (i32, i32) {
    %c0_i32 = arith.constant 0 : i32
    %c0_i32_0 = arith.constant 0 : i32
    return %arg0, %c0_i32 : i32, i32
  }
  func.func @transform_1(%arg0: i32) -> (i32, i32) {
    %c0_i32 = arith.constant 0 : i32
    %c0_i32_0 = arith.constant 0 : i32
    %c0_i32_1 = arith.constant 0 : i32
    return %c0_i32, %c0_i32_0 : i32, i32
  }
  func.func @transform_2(%arg0: i32) -> (i32, i32) {
    %c0_i32 = arith.constant 0 : i32
    %c0_i32_0 = arith.constant 0 : i32
    %c0_i32_1 = arith.constant 0 : i32
    return %c0_i32, %c0_i32_0 : i32, i32
  }
  func.func @transform_3(%arg0: i32) -> (i32, i32) {
    %c0_i32 = arith.constant 0 : i32
    %c0_i32_0 = arith.constant 0 : i32
    %c0_i32_1 = arith.constant 0 : i32
    return %c0_i32, %c0_i32_0 : i32, i32
  }
  func.func @transform_4(%arg0: i32) -> (i32, i32) {
    %c0_i32 = arith.constant 0 : i32
    %c0_i32_0 = arith.constant 0 : i32
    %c0_i32_1 = arith.constant 0 : i32
    return %c0_i32, %c0_i32_0 : i32, i32
  }
  func.func @transform_5(%arg0: i32) -> (i32, i32) {
    %c0_i32 = arith.constant 0 : i32
    %c0_i32_0 = arith.constant 0 : i32
    return %arg0, %c0_i32 : i32, i32
  }
}

</mosaic_0001>

<bundles_post_ra>
// kernel: tpu_custom_call.1
= control target key start
LH: loop header
LB: loop body
LE: loop exit
PB: predicated region body
PF: predicated region fallthrough
CT: control target
= control target key end

     0   :  { %10 = vsyncpa [#allocation3], 0  ;;  %s1147_s0 = inlined_call_operand.hbm [shape: bf16[8,768], index: 0, kind: input, shape index: {}]   ;;  %s1148_s1 = inlined_call_operand.hbm [shape: bf16[768,128], index: 1, kind: input, shape index: {}]   ;;  %s1149_s2 = inlined_call_operand.vmem [shape: f32[1,128], index: 2, kind: input, shape index: {}]   ;;  %s1150_s3 = inlined_call_operand.hbm [shape: bf16[128,128], index: 3, kind: input, shape index: {}]   ;;  %s1151_s4 = inlined_call_operand.vmem [shape: f32[1,128], index: 4, kind: input, shape index: {}]   ;;  %s1152_s5 = inlined_call_operand.hbm [shape: f32[8,128], index: 5, kind: output, shape index: {}]  }
   0x1   :  { %11 = vsyncpa [#allocation6], 0 }
   0x2   :  { %12 = vsyncpa [#allocation4], 0  ;;  %s1049_s18 = smov [#allocation5]   ;;  %s955_s22 = scalar_lea.hbm %s1148_s1, 6144 }
   0x3   :  { %s28_s19 = sshll.u32 %s1049_s18, 4  ;;  %p956_p0 = scmp.ne.s32.totalorder %s1148_s1, %s955_s22  ;;  %s29_s19 = int_to_ptr.vmem [resolvable:$true] %s28_s19 }
   0x4   :  { %p959_p1 = scmp.lt.u32.totalorder %s955_s22, %s1148_s1 }
   0x6   :  { %p961_p2 = pnand %p959_p1, %p956_p0 }
   0x8   :  { %964 = shalt.err (!%p961_p2)
}
   0x9   :  { %s965_s27 = scalar_lea.vmem %s29_s19, 6144  ;;  %p970_p4 = scmp.lt.s32.totalorder %s29_s19, %s29_s19 }
   0xa   :  { %p966_p3 = scmp.ne.s32.totalorder %s29_s19, %s965_s27  ;;  %p971_p5 = scmp.lt.s32.totalorder %s965_s27, %s965_s27 }
   0xc   :  { %p972_p6 = por %p971_p5, %p970_p4 }
   0xe   :  { %p973_p7 = pnand %p972_p6, %p966_p3 }
  0x10   :  { %976 = shalt.err (!%p973_p7)
}
  0x11   :  { %s1050_s28 = smov 64   ;;  %s1051_s29 = smov 4  }
  0x12   :  { %34 = dma.hbm_to_vmem [thread:$0]  %s1148_s1, 6144, %s29_s19, [#allocation6], %s1050_s28, %s1050_s28, %s1051_s29  }
  0x13   :  { %s1052_s7 = smov [#allocation2]   ;;  %s1053_s9 = smov [#allocation7]  }
  0x14   :  { %s19_s8 = sshll.u32 %s1052_s7, 4  ;;  %s42_s10 = sshll.u32 %s1053_s9, 4  ;;  %s20_s8 = int_to_ptr.vmem [resolvable:$true] %s19_s8  ;;  %s43_s10 = int_to_ptr.vmem [resolvable:$true] %s42_s10 }
  0x15   :  { %s977_s13 = scalar_lea.hbm %s1147_s0, 384 }
  0x16   :  { %p978_p8 = scmp.ne.s32.totalorder %s1147_s0, %s977_s13  ;;  %p981_p9 = scmp.lt.u32.totalorder %s977_s13, %s1147_s0 }
  0x18   :  { %p983_p10 = pnand %p981_p9, %p978_p8 }
  0x1a   :  { %986 = shalt.err (!%p983_p10)
}
  0x1b   :  { %s987_s1 = scalar_lea.vmem %s20_s8, 384  ;;  %p992_p12 = scmp.lt.s32.totalorder %s20_s8, %s20_s8 }
  0x1c   :  { %p988_p11 = scmp.ne.s32.totalorder %s20_s8, %s987_s1  ;;  %p993_p13 = scmp.lt.s32.totalorder %s987_s1, %s987_s1 }
  0x1e   :  { %p994_p0 = por %p993_p13, %p992_p12 }
  0x20   :  { %p995_p1 = pnand %p994_p0, %p988_p11 }
  0x22   :  { %998 = shalt.err (!%p995_p1)
}
  0x23   :  { %22 = dma.hbm_to_vmem [thread:$0]  %s1147_s0, 384, %s20_s8, [#allocation3]  }
  0x24   :  { %s999_s22 = scalar_lea.hbm %s1150_s3, 1024 }
  0x25   :  { %p1000_p2 = scmp.ne.s32.totalorder %s1150_s3, %s999_s22  ;;  %p1003_p3 = scmp.lt.u32.totalorder %s999_s22, %s1150_s3 }
  0x27   :  { %p1005_p4 = pnand %p1003_p3, %p1000_p2 }
  0x29   :  { %1008 = shalt.err (!%p1005_p4)
}
  0x2a   :  { %s1009_s27 = scalar_lea.vmem %s43_s10, 1024  ;;  %p1014_p6 = scmp.lt.s32.totalorder %s43_s10, %s43_s10 }
  0x2b   :  { %p1010_p5 = scmp.ne.s32.totalorder %s43_s10, %s1009_s27  ;;  %p1015_p7 = scmp.lt.s32.totalorder %s1009_s27, %s1009_s27 }
  0x2d   :  { %p1016_p8 = por %p1015_p7, %p1014_p6 }
  0x2f   :  { %p1017_p9 = pnand %p1016_p8, %p1010_p5 }
  0x31   :  { %1020 = shalt.err (!%p1017_p9)
}
  0x32   :  { %48 = dma.hbm_to_vmem [thread:$0]  %s1150_s3, 1024, %s43_s10, [#allocation6], %s1050_s28, %s1050_s28, %s1051_s29  }
  0x33   :  { %1043 = dma.done.wait [#allocation3], 384  }
  0x34   :  { %1044 = vsyncadd [#allocation3], 4294966912 }
  0x35   :  { %1045 = dma.done.wait [#allocation6], 7168  }
  0x36   :  { %1046 = vsyncadd [#allocation6], 4294960128  ;;  %v893_v0 = vld [vmem:[#allocation5 + $0x40] sm:$0xff]   ;;  %v897_v4 = vld [vmem:[#allocation5 + $0x48] sm:$0xff]   ;;  %v1054_v58 = vmov 0.0   ;;  %vm1055_vm0 = vmmov 0  }
  0x37   :  { %v894_v1 = vld [vmem:[#allocation5] sm:$0xff]   ;;  %790 = vmatprep.subr.bf16.mxu0 %v893_v0  ;;  %v898_v5 = vld [vmem:[#allocation5 + $0x8] sm:$0xff]   ;;  %v901_v8 = vld [vmem:[#allocation5 + $0x50] sm:$0xff]   ;;  %s1056_s6 = smov [#allocation8]  }
  0x38   :  { %v895_v2 = vld [vmem:[#allocation5 + $0xc0] sm:$0xff]   ;;  %791 = vmatpush3.bf16.msra.mxu0 %v894_v1  ;;  %v899_v6 = vld [vmem:[#allocation5 + $0xc8] sm:$0xff]   ;;  %v902_v9 = vld [vmem:[#allocation5 + $0x10] sm:$0xff]   ;;  %s716_s7 = sshll.u32 %s1056_s6, 4  ;;  %s717_s7 = int_to_ptr.vmem [resolvable:$true] %s716_s7 }
  0x39   :  { %v896_v3 = vld [vmem:[#allocation5 + $0x80] sm:$0xff]   ;;  %812 = vmatprep.subr.bf16.mxu1 %v895_v2  ;;  %792 = vmatprep.subr.bf16.mxu0 %v897_v4  ;;  %v900_v7 = vld [vmem:[#allocation5 + $0x88] sm:$0xff]   ;;  %v903_v10 = vld [vmem:[#allocation5 + $0xd0] sm:$0xff]   ;;  %s1021_s8 = scalar_lea.vmem %s717_s7, 128  ;;  %p1026_p11 = scmp.lt.s32.totalorder %s717_s7, %s717_s7 }
  0x3a   :  { %813 = vmatpush3.bf16.msra.mxu1 %v896_v3  ;;  %v904_v11 = vld [vmem:[#allocation5 + $0x90] sm:$0xff]   ;;  %v905_v12 = vld [vmem:[#allocation5 + $0x58] sm:$0xff]   ;;  %v909_v16 = vld [vmem:[#allocation5 + $0x60] sm:$0xff]   ;;  %p1022_p10 = scmp.ne.s32.totalorder %s717_s7, %s1021_s8  ;;  %p1027_p12 = scmp.lt.s32.totalorder %s1021_s8, %s1021_s8 }
  0x3b   :  { %814 = vmatprep.subr.bf16.mxu1 %v899_v6  ;;  %v906_v13 = vld [vmem:[#allocation5 + $0x18] sm:$0xff]   ;;  %v910_v17 = vld [vmem:[#allocation5 + $0x20] sm:$0xff]   ;;  %v913_v20 = vld [vmem:[#allocation5 + $0x68] sm:$0xff]  }
  0x3c   :  { %793 = vmatpush3.bf16.msra.mxu0 %v898_v5  ;;  %v907_v14 = vld [vmem:[#allocation5 + $0xd8] sm:$0xff]   ;;  %v911_v18 = vld [vmem:[#allocation5 + $0xe0] sm:$0xff]   ;;  %v914_v21 = vld [vmem:[#allocation5 + $0x28] sm:$0xff]   ;;  %p1028_p13 = por %p1027_p12, %p1026_p11 }
  0x3d   :  { %794 = vmatprep.subr.bf16.mxu0 %v901_v8  ;;  %v908_v15 = vld [vmem:[#allocation5 + $0x98] sm:$0xff]   ;;  %v912_v19 = vld [vmem:[#allocation5 + $0xa0] sm:$0xff]   ;;  %v915_v22 = vld [vmem:[#allocation5 + $0xe8] sm:$0xff]  }
  0x3e   :  { %815 = vmatpush3.bf16.msra.mxu1 %v900_v7  ;;  %v916_v23 = vld [vmem:[#allocation5 + $0xa8] sm:$0xff]   ;;  %v917_v24 = vld [vmem:[#allocation5 + $0x70] sm:$0xff]   ;;  %v921_v28 = vld [vmem:[#allocation5 + $0x78] sm:$0xff]   ;;  %p1029_p0 = pnand %p1028_p13, %p1022_p10 }
  0x3f   :  { %816 = vmatprep.subr.bf16.mxu1 %v903_v10  ;;  %v918_v25 = vld [vmem:[#allocation5 + $0x30] sm:$0xff]   ;;  %v922_v29 = vld [vmem:[#allocation5 + $0x38] sm:$0xff]   ;;  %v61_v31 = vld [vmem:[#allocation2] sm:$0xff] }
  0x40   :  { %795 = vmatpush3.bf16.msra.mxu0 %v902_v9  ;;  %v919_v26 = vld [vmem:[#allocation5 + $0xf0] sm:$0xff]   ;;  %v923_v30 = vld [vmem:[#allocation5 + $0xf8] sm:$0xff]   ;;  %v727_v32 = vcombine.low %v61_v31, %v61_v31  ;;  %v728_v33 = vcombine.high %v61_v31, %v61_v31  ;;  %v927_v35 = vld [vmem:[#allocation5 + $0x140] sm:$0xff]  }
  0x41   :  { %796 = vmatprep.subr.bf16.mxu0 %v905_v12  ;;  %v920_v27 = vld [vmem:[#allocation5 + $0xb0] sm:$0xff]   ;;  %v926_v34 = vld [vmem:[#allocation5 + $0xb8] sm:$0xff]   ;;  %v930_v39 = vld [vmem:[#allocation5 + $0x100] sm:$0xff]  }
  0x42   :  { %817 = vmatpush3.bf16.msra.mxu1 %v904_v11  ;;  %v62_v36 = vld [vmem:[#allocation2 + $0x8] sm:$0xff]  ;;  %508 = vmatprep.mubr.bf16.mxu0 %v728_v33  ;;  %v931_v40 = vld [vmem:[#allocation5 + $0x148] sm:$0xff]   ;;  %v935_v44 = vld [vmem:[#allocation5 + $0x158] sm:$0xff]  }
  0x43   :  { %818 = vmatprep.subr.bf16.mxu1 %v907_v14  ;;  %v729_v37 = vcombine.low %v62_v36, %v62_v36  ;;  %v730_v38 = vcombine.high %v62_v36, %v62_v36  ;;  %v932_v41 = vld [vmem:[#allocation5 + $0x108] sm:$0xff]   ;;  %v933_v42 = vld [vmem:[#allocation5 + $0x150] sm:$0xff]   ;;  %v936_v45 = vld [vmem:[#allocation5 + $0x118] sm:$0xff]  }
  0x44   :  { %797 = vmatpush3.bf16.msra.mxu0 %v906_v13  ;;  %v934_v43 = vld [vmem:[#allocation5 + $0x110] sm:$0xff]   ;;  %v937_v46 = vld [vmem:[#allocation5 + $0x160] sm:$0xff]   ;;  %v939_v48 = vld [vmem:[#allocation5 + $0x168] sm:$0xff]  }
  0x45   :  { %798 = vmatprep.subr.bf16.mxu0 %v909_v16  ;;  %548 = vmatprep.mubr.bf16.mxu1 %v730_v38  ;;  %v938_v47 = vld [vmem:[#allocation5 + $0x120] sm:$0xff]   ;;  %v63_v49 = vld [vmem:[#allocation2 + $0x10] sm:$0xff]  ;;  %v940_v51 = vld [vmem:[#allocation5 + $0x128] sm:$0xff]  }
  0x46   :  { %819 = vmatpush3.bf16.msra.mxu1 %v908_v15  ;;  %v732_v50 = vcombine.high %v63_v49, %v63_v49  ;;  %v941_v52 = vld [vmem:[#allocation5 + $0x170] sm:$0xff]   ;;  %v943_v54 = vld [vmem:[#allocation5 + $0x178] sm:$0xff]   ;;  %v731_v56 = vcombine.low %v63_v49, %v63_v49  ;;  %v947_v57 = vld [vmem:[#allocation7] sm:$0xff]  }
  0x47   :  { %820 = vmatprep.subr.bf16.mxu1 %v911_v18  ;;  %v942_v53 = vld [vmem:[#allocation5 + $0x130] sm:$0xff]   ;;  %v944_v55 = vld [vmem:[#allocation5 + $0x138] sm:$0xff]   ;;  %v948_v59 = vld [vmem:[#allocation7 + $0x8] sm:$0xff]  }
  0x48   :  { %799 = vmatpush3.bf16.msra.mxu0 %v910_v17  ;;  %v949_v60 = vld [vmem:[#allocation7 + $0x10] sm:$0xff]   ;;  %v950_v61 = vld [vmem:[#allocation7 + $0x18] sm:$0xff]   ;;  %v951_v62 = vld [vmem:[#allocation7 + $0x20] sm:$0xff]  }
  0x49   :  { %800 = vmatprep.subr.bf16.mxu0 %v913_v20  ;;  %v952_v63 = vld [vmem:[#allocation7 + $0x28] sm:$0xff]   ;;  %v953_v0 = vld [vmem:[#allocation7 + $0x30] sm:$0xff]   ;;  %v954_v1 = vld [vmem:[#allocation7 + $0x38] sm:$0xff]  }
  0x4a   :  { %821 = vmatpush3.bf16.msra.mxu1 %v912_v19  ;;  %v726_v3 = vld [vmem:[%s1149_s2] ss:$0 sm:$0xff] }
  0x4b   :  { %822 = vmatprep.subr.bf16.mxu1 %v915_v22 }
  0x4c   :  { %801 = vmatpush3.bf16.msra.mxu0 %v914_v21 }
  0x4d   :  { %802 = vmatprep.subr.bf16.mxu0 %v917_v24 }
  0x4e   :  { %823 = vmatpush3.bf16.msra.mxu1 %v916_v23  ;;  %v781_v23 = vld [vmem:[%s1151_s4] ss:$0 sm:$0xff] }
  0x4f   :  { %824 = vmatprep.subr.bf16.mxu1 %v919_v26 }
  0x50   :  { %803 = vmatpush3.bf16.msra.mxu0 %v918_v25 }
  0x51   :  { %804 = vmatprep.subr.bf16.mxu0 %v921_v28 }
  0x52   :  { %825 = vmatpush3.bf16.msra.mxu1 %v920_v27 }
  0x53   :  { %826 = vmatprep.subr.bf16.mxu1 %v923_v30 }
  0x54   :  { %805 = vmatpush3.bf16.msra.mxu0 %v922_v29 }
  0x55   :  { %834 = vmatprep.subr.bf16.mxu0 %v927_v35 }
  0x56   :  { %827 = vmatpush3.bf16.msra.mxu1 %v926_v34 }
  0x57   :  { %509 = vmatmul.mubr.bf16.vlgmr.msra.gmra.mrb[0].mxu0 %v727_v32  ;;  %865 = vmatprep.subr.bf16.mxu1 %v1054_v58 }
  0x58   :  { %835 = vmatpush3.bf16.msra.mxu0 %v930_v39  ;;  %588 = vmatprep.mubr.bf16.mxu0 %v732_v50 }
  0x59   :  { %549 = vmatmul.mubr.bf16.vlgmr.msra.gmra.mrb[0].mxu1 %v729_v37  ;;  %836 = vmatprep.subr.bf16.mxu0 %v931_v40 }
  0x5a   :  { %866 = vmatpush3.bf16.msra.mxu1 %v947_v57  ;;  %881 = vmatprep.mubr.msk.bf16.mxu1 %vm1055_vm0, %v1054_v58 }
  0x5b   :  { %867 = vmatprep.subr.bf16.mxu1 %v1054_v58 }
  0x5c   :  { %837 = vmatpush3.bf16.msra.mxu0 %v932_v41 }
  0x5d   :  { %838 = vmatprep.subr.bf16.mxu0 %v933_v42 }
  0x5e   :  { %868 = vmatpush3.bf16.msra.mxu1 %v948_v59 }
  0x5f   :  { %869 = vmatprep.subr.bf16.mxu1 %v1054_v58 }
  0x60   :  { %839 = vmatpush3.bf16.msra.mxu0 %v934_v43 }
  0x61   :  { %840 = vmatprep.subr.bf16.mxu0 %v935_v44 }
  0x62   :  { %870 = vmatpush3.bf16.msra.mxu1 %v949_v60 }
  0x63   :  { %871 = vmatprep.subr.bf16.mxu1 %v1054_v58 }
  0x64   :  { %841 = vmatpush3.bf16.msra.mxu0 %v936_v45 }
  0x65   :  { %842 = vmatprep.subr.bf16.mxu0 %v937_v46 }
  0x66   :  { %872 = vmatpush3.bf16.msra.mxu1 %v950_v61 }
  0x67   :  { %873 = vmatprep.subr.bf16.mxu1 %v1054_v58 }
  0x68   :  { %843 = vmatpush3.bf16.msra.mxu0 %v938_v47 }
  0x69   :  { %844 = vmatprep.subr.bf16.mxu0 %v939_v48 }
  0x6a   :  { %874 = vmatpush3.bf16.msra.mxu1 %v951_v62 }
  0x6b   :  { %875 = vmatprep.subr.bf16.mxu1 %v1054_v58 }
  0x6c   :  { %845 = vmatpush3.bf16.msra.mxu0 %v940_v51 }
  0x6d   :  { %846 = vmatprep.subr.bf16.mxu0 %v941_v52 }
  0x6e   :  { %876 = vmatpush3.bf16.msra.mxu1 %v952_v63 }
  0x6f   :  { %877 = vmatprep.subr.bf16.mxu1 %v1054_v58 }
  0x70   :  { %847 = vmatpush3.bf16.msra.mxu0 %v942_v53 }
  0x71   :  { %848 = vmatprep.subr.bf16.mxu0 %v943_v54 }
  0x72   :  { %878 = vmatpush3.bf16.msra.mxu1 %v953_v0 }
  0x73   :  { %879 = vmatprep.subr.bf16.mxu1 %v1054_v58 }
  0x74   :  { %849 = vmatpush3.bf16.msra.mxu0 %v944_v55 }
  0x76   :  { %880 = vmatpush3.bf16.msra.mxu1 %v954_v1 }
  0x77   :  { %589 = vmatmul.mubr.bf16.vlgmr.msra.gmra.mrb[4].mxu0 %v731_v56 }
 0x12a   :  { %v806_v2 = vpop.f32.mrb[0].mxu0 }
 0x12b   :  { %v807_v4 = vpop.f32.mrb[1].mxu0 }
 0x12c   :  { %v808_v5 = vadd.f32 %v807_v4, %v806_v2  ;;  %v809_v6 = vpop.f32.mrb[2].mxu0  ;;  %v828_v7 = vpop.f32.mrb[0].mxu1 }
 0x12d   :  { %v810_v8 = vpop.f32.mrb[3].mxu0  ;;  %v829_v9 = vpop.f32.mrb[1].mxu1 }
 0x12e   :  { %v511_v10 = vadd.f32 %v808_v5, %v726_v3  ;;  %v830_v11 = vadd.f32 %v829_v9, %v828_v7  ;;  %v831_v12 = vpop.f32.mrb[2].mxu1 }
 0x12f   :  { %v832_v13 = vpop.f32.mrb[3].mxu1 }
 0x130   :  { %v551_v14 = vadd.f32 %v830_v11, %v511_v10 }
 0x14a   :  { %v850_v15 = vpop.f32.mrb[4].mxu0 }
 0x14b   :  { %v851_v16 = vpop.f32.mrb[5].mxu0 }
 0x14c   :  { %v852_v17 = vadd.f32 %v851_v16, %v850_v15  ;;  %v853_v18 = vpop.f32.mrb[6].mxu0 }
 0x14d   :  { %v854_v19 = vpop.f32.mrb[7].mxu0 }
 0x14e   :  { %v591_v20 = vadd.f32 %v852_v17, %v551_v14 }
 0x150   :  { %v596_v21 = vmax.f32 %v591_v20, 0.0 }
 0x152   :  { %v597_v22 = vpack.c.bf16 %v596_v21, %v596_v21 }
 0x154   :  { %882 = vmatmul.mubr.bf16.vlgmr.msra.gmra.mrb[4].mxu1 %v597_v22 }
 0x227   :  { %v703_v24 = vpop.f32.mrb[4].mxu1 }
 0x228   :  { %v704_v25 = vadd.f32 %v781_v23, %v703_v24  ;;  %v883_v26 = vpop.f32.mrb[5].mxu1 }
 0x229   :  { %v706_v27 = vpop.f32.mrb[6].mxu1 }
 0x22a   :  { %709 = vst [vmem:[#allocation8] sm:$0xff] %v704_v25  ;;  %v884_v28 = vpop.f32.mrb[7].mxu1 }
 0x22b   :  { %1032 = shalt.err (!%p1029_p0)
}
 0x22c   :  { %s1033_s4 = scalar_lea.hbm %s1152_s5, 128 }
 0x22d   :  { %p1034_p1 = scmp.ne.s32.totalorder %s1152_s5, %s1033_s4  ;;  %p1037_p2 = scmp.lt.u32.totalorder %s1033_s4, %s1152_s5 }
 0x22f   :  { %p1039_p3 = pnand %p1037_p2, %p1034_p1 }
 0x231   :  { %1042 = shalt.err (!%p1039_p3)
}
 0x232   :  { %719 = dma.vmem_to_hbm [thread:$0]  %s717_s7, 128, %s1152_s5, [#allocation4]  }
 0x233   :  { %1047 = dma.done.wait [#allocation4], 128  }
 0x234   :  { %1048 = vsyncadd [#allocation4], 4294967168 }
 0x235   :  { %723 = vsyncpa [#allocation3], 1 }
 0x236   :  { %724 = vsyncpa [#allocation6], 1 }
 0x237   :  { %725 = vsyncpa [#allocation4], 1 }

</bundles_post_ra>
